<compile_context>
chip_gen: v7x
topology: tpu7x:2x2x1
jax: 0.10.0
libtpu: 0.0.40
codegen_flags: <defaults>
</compile_context>

<pallas_src>
import functools
import math

import jax
import jax.numpy as jnp
from jax.experimental import pallas as pl
from jax.experimental.pallas import tpu as pltpu


def _softplus(x):
    # numerically stable softplus (torch.nn.Softplus default semantics)
    return jnp.maximum(x, 0.0) + jnp.log1p(jnp.exp(-jnp.abs(x)))


def _state_prediction_kernel(
    x_ref, si_ref, bias_ref,
    w1_ref, b1_ref, w2_ref, b2_ref, w3_ref, b3_ref,
    wp_ref, bp_ref, wmv_ref, bmv_ref,
    wln_ref, weo_ref, wea_ref, mpre_ref,
    logs_ref, mv_ref,
    *, num_agents, s_dim, inv_temperature):
    f32 = jnp.float32
    N = num_agents
    L = x_ref.shape[1]                       # lanes in this block (= row_tile * N)

    def mm(w_ref, a):
        # f32 x f32 -> f32 on the MXU (portable: also runs on the CPU executor
        # used by interpret mode).
        return jnp.dot(w_ref[...], a, preferred_element_type=f32)

    # ---- state_network: Linear -> ReLU -> Linear -> ReLU -> Linear ---------
    h = jnp.maximum(mm(w1_ref, x_ref[...]) + b1_ref[...], 0.0)
    h = jnp.maximum(mm(w2_ref, h) + b2_ref[...], 0.0)
    n_out = mm(w3_ref, h) + b3_ref[...]                         # [G, L]

    # ---- s_update_net + fused (mean | softplus-var) head -------------------
    u = jnp.maximum(mm(wp_ref, n_out) + bp_ref[...], 0.0)
    mv = mm(wmv_ref, u) + bmv_ref[...]                          # [2S, L]
    row = jax.lax.broadcasted_iota(jnp.int32, mv.shape, 0)
    mv_ref[...] = jnp.where(row < s_dim, mv, _softplus(mv))     # rows >= S -> softplus

    # ---- vectorised autoregressive agent-existence log-prob ----------------
    # edge_net folded into the logit head (weight compositions done once in
    # the wrapper):  msg_j @ wlm = excl_cumsum_k((weo@wlm).n_out_k)
    #                              + j*((wea@wlm).n_out_j + be@wlm)
    #                              + excl_cumsum_k(i_k)*(wef@wlm)
    # The last two pieces live in bias_ref (computed in the wrapper).
    dot_n = mm(wln_ref, n_out)                                  # [1, L]
    d_eo = mm(weo_ref, n_out)                                   # [1, L]
    d_ea = mm(wea_ref, n_out)                                   # [1, L]

    # exclusive prefix sum over the agent group of adjacent lanes, as one
    # matmul against a constant block-strictly-lower-triangular mask.
    exc_eo = jnp.dot(d_eo, mpre_ref[...], preferred_element_type=f32)

    aidx = jax.lax.broadcasted_iota(jnp.int32, (1, L), 1) % N   # agent id per lane
    af = aidx.astype(f32)

    logit = (dot_n + exc_eo + af * d_ea + bias_ref[...]) * inv_temperature
    si = si_ref[...]                                            # sampled i_{t+1}
    # Bernoulli(probs=sigmoid(logit)).log_prob(si); agent 0 contributes 0.
    logp = -(si * _softplus(-logit) + (1.0 - si) * _softplus(logit))
    logs_ref[...] = jnp.where(aidx == 0, 0.0, logp)


# ---------------------------------------------------------------------------
# parameter construction (deterministic, PyTorch-Linear-style uniform init)
# ---------------------------------------------------------------------------
def _linear(key, fan_in, fan_out):
    kw, kb = jax.random.split(key)
    bound = 1.0 / (fan_in ** 0.5)
    w = jax.random.uniform(kw, (fan_in, fan_out), jnp.float32, -bound, bound)
    b = jax.random.uniform(kb, (1, fan_out), jnp.float32, -bound, bound)
    return w, b


def init_params(key, action_encoding, s_dim, h_dim, gnn_hdim1, gnn_hdim2,
                gnn_out_dim, s_projection_size, autoreg_m_size):
    d_in = s_dim + h_dim + action_encoding + 1
    ks = jax.random.split(key, 8)
    p = {}
    p["w1"], p["b1"] = _linear(ks[0], d_in, gnn_hdim1)
    p["w2"], p["b2"] = _linear(ks[1], gnn_hdim1, gnn_hdim2)
    p["w3"], p["b3"] = _linear(ks[2], gnn_hdim2, gnn_out_dim)
    p["wp"], p["bp"] = _linear(ks[3], gnn_out_dim, s_projection_size)
    p["wm"], p["bm"] = _linear(ks[4], s_projection_size, s_dim)
    p["wv"], p["bv"] = _linear(ks[5], s_projection_size, s_dim)
    p["we"], p["be"] = _linear(ks[6], 2 * gnn_out_dim + 1, autoreg_m_size)
    p["wl"], p["bl"] = _linear(ks[7], gnn_out_dim + autoreg_m_size + 1, 1)
    return p


# ---------------------------------------------------------------------------
# wrapper == StatePredictionNetwork.forward
# ---------------------------------------------------------------------------
def state_prediction_forward(params, theta, s, prev_flag, prev_acts, sampled_i,
                             temperature=1.0, lane_target=512):
    f32 = jnp.float32
    B, P, N, _ = theta.shape
    S = s.shape[-1]
    R = B * P

    H1 = params["w1"].shape[1]
    H2 = params["w2"].shape[1]
    G = params["w3"].shape[1]
    SP = params["wp"].shape[1]
    m = params["be"].shape[1]
    D_in = params["w1"].shape[0]

    # ---- tiling over the batch*particle axis (TL = TR*N, multiple of 128) ---
    tr_min = 128 // math.gcd(128, N)
    target = max(tr_min, ((lane_target // N) // tr_min) * tr_min)
    TR = min(target, -(-R // tr_min) * tr_min)     # rows per grid step
    R_pad = -(-R // TR) * TR
    TL = TR * N                                    # lanes per grid step
    grid = (R_pad // TR,)

    def to_cols(t):                                # [B,P,N,D] -> [D, R_pad*N]
        d = t.shape[-1]
        t = jnp.transpose(t, (3, 0, 1, 2)).reshape(d, R, N)
        t = jnp.pad(t, ((0, 0), (0, R_pad - R), (0, 0)))
        return t.reshape(d, R_pad * N).astype(f32)

    # ---- weight plumbing: transpose for the column layout, fuse mean|var
    #      heads, fold edge_net into the logit head (pure linear algebra) ------
    w1T = params["w1"].T.astype(f32);  b1T = params["b1"].T.astype(f32)
    w2T = params["w2"].T.astype(f32);  b2T = params["b2"].T.astype(f32)
    w3T = params["w3"].T.astype(f32);  b3T = params["b3"].T.astype(f32)
    wpT = params["wp"].T.astype(f32);  bpT = params["bp"].T.astype(f32)
    wmvT = jnp.concatenate([params["wm"], params["wv"]], axis=1).T.astype(f32)
    bmvT = jnp.concatenate([params["bm"], params["bv"]], axis=1).T.astype(f32)

    we, be = params["we"], params["be"]
    wl, blp = params["wl"], params["bl"]
    wlm = wl[G:G + m]                                         # [m, 1]
    wln_row = wl[:G].T.astype(f32)                            # [1, G]
    weo_row = (we[:G] @ wlm).T.astype(f32)                    # [1, G] = (weo @ wlm)^T
    wea_row = (we[G:2 * G] @ wlm).T.astype(f32)               # [1, G] = (wea @ wlm)^T
    wlf = wl[G + m, 0]                                        # prev-flag weight
    bl = blp[0, 0]                                            # logit bias
    c_be = (be @ wlm)[0, 0]                                   # be  @ wlm
    c_ef = (we[2 * G:2 * G + 1] @ wlm)[0, 0]                  # wef @ wlm

    # per-column additive logit bias: everything independent of the in-kernel
    # MLP output  ==  pf*wlf + bl + j*(be@wlm) + (wef@wlm)*sum_{k<j} i_k
    exc_si = jnp.cumsum(sampled_i, axis=2) - sampled_i
    agent_f = jnp.arange(N, dtype=f32).reshape(1, 1, N, 1)
    bias = prev_flag * wlf + bl + agent_f * c_be + exc_si * c_ef

    x = to_cols(jnp.concatenate([theta, s, prev_acts, prev_flag], axis=-1))
    si = to_cols(sampled_i)
    bias_c = to_cols(bias)

    # block-strictly-lower-triangular prefix mask (constant across the grid):
    # Mpre[k, c] = 1 iff lanes k, c share an agent group and (k % N) < (c % N)
    lane = jnp.arange(TL)
    same_grp = (lane[:, None] // N) == (lane[None, :] // N)
    strictly_lower = (lane[:, None] % N) < (lane[None, :] % N)
    mpre = (same_grp & strictly_lower).astype(f32)

    weights = [w1T, b1T, w2T, b2T, w3T, b3T, wpT, bpT, wmvT, bmvT,
               wln_row, weo_row, wea_row, mpre]

    def col_spec(d):
        return pl.BlockSpec((d, TL), lambda i: (0, i))

    def const_spec(a):
        return pl.BlockSpec(a.shape, lambda i: (0, 0))         # VMEM-resident

    in_specs = [col_spec(D_in), col_spec(1), col_spec(1)]
    in_specs += [const_spec(a) for a in weights]
    out_specs = (pl.BlockSpec((1, TL), lambda i: (0, i)),
                 pl.BlockSpec((2 * S, TL), lambda i: (0, i)))
    out_shape = (jax.ShapeDtypeStruct((1, R_pad * N), f32),
                 jax.ShapeDtypeStruct((2 * S, R_pad * N), f32))

    Lt = R_pad * N
    flops = 2 * Lt * (D_in * H1 + H1 * H2 + H2 * G + G * SP + SP * 2 * S
                      + 3 * G + TL)
    transc = Lt * (2 * S + 4)
    bytes_acc = sum(int(a.size) * a.dtype.itemsize
                    for a in [x, si, bias_c] + weights)
    bytes_acc += Lt * (1 + 2 * S) * 4

    kernel = functools.partial(_state_prediction_kernel, num_agents=N, s_dim=S,
                               inv_temperature=float(1.0 / temperature))

    logs, mv = pl.pallas_call(
        kernel,
        out_shape=out_shape,
        grid_spec=pltpu.PrefetchScalarGridSpec(
            num_scalar_prefetch=0, grid=grid,
            in_specs=in_specs, out_specs=out_specs),
        compiler_params=pltpu.CompilerParams(
            dimension_semantics=("parallel",),
            vmem_limit_bytes=32 * 1024 * 1024),
        cost_estimate=pl.CostEstimate(flops=int(flops),
                                      transcendentals=int(transc),
                                      bytes_accessed=int(bytes_acc)),
    )(x, si, bias_c, *weights)

    # back to the PyTorch (batch, particles, agents, feat) convention
    agent_existence_logs = logs.reshape(R_pad, N)[:R].reshape(B, P, N, 1)
    mv = mv.reshape(2 * S, R_pad, N)[:, :R, :]
    mv = jnp.transpose(mv, (1, 2, 0)).reshape(B, P, N, 2 * S)
    s_rep_mean = mv[..., :S]
    s_rep_var = mv[..., S:]
    return agent_existence_logs, (s_rep_mean, s_rep_var)


if __name__ == "__main__":
    key = jax.random.PRNGKey(0)
    B, P, N = 2, 4, 4
    action_encoding, s_dim, h_dim = 4, 8, 8
    gnn_hdim1, gnn_hdim2, gnn_out_dim = 32, 32, 16
    s_projection_size, autoreg_m_size = 16, 16

    pkey, dkey = jax.random.split(key)
    params = init_params(pkey, action_encoding, s_dim, h_dim, gnn_hdim1,
                         gnn_hdim2, gnn_out_dim, s_projection_size,
                         autoreg_m_size)

    k1, k2, k3, k4, k5 = jax.random.split(dkey, 5)
    theta = jax.random.normal(k1, (B, P, N, h_dim), jnp.float32)
    s_prev = jax.random.normal(k2, (B, P, N, s_dim), jnp.float32)
    prev_acts = jax.random.normal(k3, (B, P, N, action_encoding), jnp.float32)
    prev_flag = jax.random.bernoulli(k4, 0.7, (B, P, N, 1)).astype(jnp.float32)
    sampled_i = jax.random.bernoulli(k5, 0.7, (B, P, N, 1)).astype(jnp.float32)

    fwd = jax.jit(functools.partial(state_prediction_forward, temperature=1.0))
    logs, (mean, var) = fwd(params, theta, s_prev, prev_flag, prev_acts, sampled_i)
    jax.block_until_ready((logs, mean, var))

    assert logs.shape == (B, P, N, 1)
    assert mean.shape == (B, P, N, s_dim)
    assert var.shape == (B, P, N, s_dim)
    print("KERNEL_OK")
</pallas_src>

<mosaic_0001>
module attributes {stable_mosaic.version = 11 : i64} {
  func.func @_state_prediction_kernel(%arg0: i32, %arg1: memref<21x128xf32, #tpu.memory_space<vmem>>, %arg2: memref<1x128xf32, #tpu.memory_space<vmem>>, %arg3: memref<1x128xf32, #tpu.memory_space<vmem>>, %arg4: memref<32x21xf32, #tpu.memory_space<vmem>>, %arg5: memref<32x1xf32, #tpu.memory_space<vmem>>, %arg6: memref<32x32xf32, #tpu.memory_space<vmem>>, %arg7: memref<32x1xf32, #tpu.memory_space<vmem>>, %arg8: memref<16x32xf32, #tpu.memory_space<vmem>>, %arg9: memref<16x1xf32, #tpu.memory_space<vmem>>, %arg10: memref<16x16xf32, #tpu.memory_space<vmem>>, %arg11: memref<16x1xf32, #tpu.memory_space<vmem>>, %arg12: memref<16x16xf32, #tpu.memory_space<vmem>>, %arg13: memref<16x1xf32, #tpu.memory_space<vmem>>, %arg14: memref<1x16xf32, #tpu.memory_space<vmem>>, %arg15: memref<1x16xf32, #tpu.memory_space<vmem>>, %arg16: memref<1x16xf32, #tpu.memory_space<vmem>>, %arg17: memref<128x128xf32, #tpu.memory_space<vmem>>, %arg18: memref<1x128xf32, #tpu.memory_space<vmem>>, %arg19: memref<16x128xf32, #tpu.memory_space<vmem>>) attributes {dimension_semantics = [#tpu.dimension_semantics<parallel>], iteration_bounds = array<i64: 1>, scalar_prefetch = 0 : i64, scratch_operands = 0 : i64, tpu.core_type = #tpu.core_type<tc>, window_params = [{transform_indices = @transform_0, window_bounds = array<i64: 21, 128>}, {transform_indices = @transform_1, window_bounds = array<i64: 1, 128>}, {transform_indices = @transform_2, window_bounds = array<i64: 1, 128>}, {pipeline_mode = #tpu.pipeline_mode<synchronous>, transform_indices = @transform_3, window_bounds = array<i64: 32, 21>}, {pipeline_mode = #tpu.pipeline_mode<synchronous>, transform_indices = @transform_4, window_bounds = array<i64: 32, 1>}, {pipeline_mode = #tpu.pipeline_mode<synchronous>, transform_indices = @transform_5, window_bounds = array<i64: 32, 32>}, {pipeline_mode = #tpu.pipeline_mode<synchronous>, transform_indices = @transform_6, window_bounds = array<i64: 32, 1>}, {pipeline_mode = #tpu.pipeline_mode<synchronous>, transform_indices = @transform_7, window_bounds = array<i64: 16, 32>}, {pipeline_mode = #tpu.pipeline_mode<synchronous>, transform_indices = @transform_8, window_bounds = array<i64: 16, 1>}, {pipeline_mode = #tpu.pipeline_mode<synchronous>, transform_indices = @transform_9, window_bounds = array<i64: 16, 16>}, {pipeline_mode = #tpu.pipeline_mode<synchronous>, transform_indices = @transform_10, window_bounds = array<i64: 16, 1>}, {pipeline_mode = #tpu.pipeline_mode<synchronous>, transform_indices = @transform_11, window_bounds = array<i64: 16, 16>}, {pipeline_mode = #tpu.pipeline_mode<synchronous>, transform_indices = @transform_12, window_bounds = array<i64: 16, 1>}, {pipeline_mode = #tpu.pipeline_mode<synchronous>, transform_indices = @transform_13, window_bounds = array<i64: 1, 16>}, {pipeline_mode = #tpu.pipeline_mode<synchronous>, transform_indices = @transform_14, window_bounds = array<i64: 1, 16>}, {pipeline_mode = #tpu.pipeline_mode<synchronous>, transform_indices = @transform_15, window_bounds = array<i64: 1, 16>}, {pipeline_mode = #tpu.pipeline_mode<synchronous>, transform_indices = @transform_16, window_bounds = array<i64: 128, 128>}, {transform_indices = @transform_17, window_bounds = array<i64: 1, 128>}, {transform_indices = @transform_18, window_bounds = array<i64: 16, 128>}]} {
    %c0 = arith.constant 0 : index
    %c0_0 = arith.constant 0 : index
    %0 = vector.load %arg1[%c0, %c0_0] : memref<21x128xf32, #tpu.memory_space<vmem>>, vector<21x128xf32>
    %c0_1 = arith.constant 0 : index
    %c0_2 = arith.constant 0 : index
    %1 = vector.load %arg4[%c0_1, %c0_2] : memref<32x21xf32, #tpu.memory_space<vmem>>, vector<32x21xf32>
    %cst = arith.constant dense<0.000000e+00> : vector<32x128xf32>
    %2 = tpu.matmul %1, %0, %cst {dimension_numbers = #tpu.dot_dimension_numbers<[1], [0], [0], [1], [0, 0, 1, 1], [], []>} : vector<32x21xf32>, vector<21x128xf32>, vector<32x128xf32> -> vector<32x128xf32>
    %c0_3 = arith.constant 0 : index
    %c0_4 = arith.constant 0 : index
    %3 = vector.load %arg5[%c0_3, %c0_4] : memref<32x1xf32, #tpu.memory_space<vmem>>, vector<32x1xf32>
    %4 = vector.broadcast %3 : vector<32x1xf32> to vector<32x128xf32>
    %5 = arith.addf %2, %4 : vector<32x128xf32>
    %cst_5 = arith.constant 0.000000e+00 : f32
    %6 = vector.broadcast %cst_5 : f32 to vector<32x128xf32>
    %7 = arith.maximumf %5, %6 : vector<32x128xf32>
    %c0_6 = arith.constant 0 : index
    %c0_7 = arith.constant 0 : index
    %8 = vector.load %arg6[%c0_6, %c0_7] : memref<32x32xf32, #tpu.memory_space<vmem>>, vector<32x32xf32>
    %cst_8 = arith.constant dense<0.000000e+00> : vector<32x128xf32>
    %9 = tpu.matmul %8, %7, %cst_8 {dimension_numbers = #tpu.dot_dimension_numbers<[1], [0], [0], [1], [0, 0, 1, 1], [], []>} : vector<32x32xf32>, vector<32x128xf32>, vector<32x128xf32> -> vector<32x128xf32>
    %c0_9 = arith.constant 0 : index
    %c0_10 = arith.constant 0 : index
    %10 = vector.load %arg7[%c0_9, %c0_10] : memref<32x1xf32, #tpu.memory_space<vmem>>, vector<32x1xf32>
    %11 = vector.broadcast %10 : vector<32x1xf32> to vector<32x128xf32>
    %12 = arith.addf %9, %11 : vector<32x128xf32>
    %cst_11 = arith.constant 0.000000e+00 : f32
    %13 = vector.broadcast %cst_11 : f32 to vector<32x128xf32>
    %14 = arith.maximumf %12, %13 : vector<32x128xf32>
    %c0_12 = arith.constant 0 : index
    %c0_13 = arith.constant 0 : index
    %15 = vector.load %arg8[%c0_12, %c0_13] : memref<16x32xf32, #tpu.memory_space<vmem>>, vector<16x32xf32>
    %cst_14 = arith.constant dense<0.000000e+00> : vector<16x128xf32>
    %16 = tpu.matmul %15, %14, %cst_14 {dimension_numbers = #tpu.dot_dimension_numbers<[1], [0], [0], [1], [0, 0, 1, 1], [], []>} : vector<16x32xf32>, vector<32x128xf32>, vector<16x128xf32> -> vector<16x128xf32>
    %c0_15 = arith.constant 0 : index
    %c0_16 = arith.constant 0 : index
    %17 = vector.load %arg9[%c0_15, %c0_16] : memref<16x1xf32, #tpu.memory_space<vmem>>, vector<16x1xf32>
    %18 = vector.broadcast %17 : vector<16x1xf32> to vector<16x128xf32>
    %19 = arith.addf %16, %18 : vector<16x128xf32>
    %c0_17 = arith.constant 0 : index
    %c0_18 = arith.constant 0 : index
    %20 = vector.load %arg10[%c0_17, %c0_18] : memref<16x16xf32, #tpu.memory_space<vmem>>, vector<16x16xf32>
    %cst_19 = arith.constant dense<0.000000e+00> : vector<16x128xf32>
    %21 = tpu.matmul %20, %19, %cst_19 {dimension_numbers = #tpu.dot_dimension_numbers<[1], [0], [0], [1], [0, 0, 1, 1], [], []>} : vector<16x16xf32>, vector<16x128xf32>, vector<16x128xf32> -> vector<16x128xf32>
    %c0_20 = arith.constant 0 : index
    %c0_21 = arith.constant 0 : index
    %22 = vector.load %arg11[%c0_20, %c0_21] : memref<16x1xf32, #tpu.memory_space<vmem>>, vector<16x1xf32>
    %23 = vector.broadcast %22 : vector<16x1xf32> to vector<16x128xf32>
    %24 = arith.addf %21, %23 : vector<16x128xf32>
    %cst_22 = arith.constant 0.000000e+00 : f32
    %25 = vector.broadcast %cst_22 : f32 to vector<16x128xf32>
    %26 = arith.maximumf %24, %25 : vector<16x128xf32>
    %c0_23 = arith.constant 0 : index
    %c0_24 = arith.constant 0 : index
    %27 = vector.load %arg12[%c0_23, %c0_24] : memref<16x16xf32, #tpu.memory_space<vmem>>, vector<16x16xf32>
    %cst_25 = arith.constant dense<0.000000e+00> : vector<16x128xf32>
    %28 = tpu.matmul %27, %26, %cst_25 {dimension_numbers = #tpu.dot_dimension_numbers<[1], [0], [0], [1], [0, 0, 1, 1], [], []>} : vector<16x16xf32>, vector<16x128xf32>, vector<16x128xf32> -> vector<16x128xf32>
    %c0_26 = arith.constant 0 : index
    %c0_27 = arith.constant 0 : index
    %29 = vector.load %arg13[%c0_26, %c0_27] : memref<16x1xf32, #tpu.memory_space<vmem>>, vector<16x1xf32>
    %30 = vector.broadcast %29 : vector<16x1xf32> to vector<16x128xf32>
    %31 = arith.addf %28, %30 : vector<16x128xf32>
    %32 = tpu.iota {dimensions = array<i32: 0>} : vector<16x128xi32>
    %c8_i32 = arith.constant 8 : i32
    %33 = vector.broadcast %c8_i32 : i32 to vector<16x128xi32>
    %34 = arith.cmpi slt, %32, %33 : vector<16x128xi32>
    %cst_28 = arith.constant 0.000000e+00 : f32
    %35 = vector.broadcast %cst_28 : f32 to vector<16x128xf32>
    %36 = arith.maximumf %31, %35 : vector<16x128xf32>
    %37 = math.absf %31 : vector<16x128xf32>
    %cst_29 = arith.constant 0.000000e+00 : f32
    %38 = vector.broadcast %cst_29 : f32 to vector<16x128xf32>
    %39 = arith.subf %38, %37 : vector<16x128xf32>
    %40 = math.exp %39 : vector<16x128xf32>
    %41 = math.log1p %40 : vector<16x128xf32>
    %42 = arith.addf %36, %41 : vector<16x128xf32>
    %43 = arith.select %34, %31, %42 : vector<16x128xi1>, vector<16x128xf32>
    %c0_30 = arith.constant 0 : index
    %c0_31 = arith.constant 0 : index
    %44 = vector.load %arg19[%c0_30, %c0_31] : memref<16x128xf32, #tpu.memory_space<vmem>>, vector<16x128xf32>
    tpu.vector_store %arg19[%c0_30, %c0_31], %43 {strides = array<i32>} : memref<16x128xf32, #tpu.memory_space<vmem>>, vector<16x128xf32>,
    %c0_32 = arith.constant 0 : index
    %c0_33 = arith.constant 0 : index
    %45 = vector.load %arg14[%c0_32, %c0_33] : memref<1x16xf32, #tpu.memory_space<vmem>>, vector<1x16xf32>
    %cst_34 = arith.constant dense<0.000000e+00> : vector<1x128xf32>
    %46 = tpu.matmul %45, %19, %cst_34 {dimension_numbers = #tpu.dot_dimension_numbers<[1], [0], [0], [1], [0, 0, 1, 1], [], []>} : vector<1x16xf32>, vector<16x128xf32>, vector<1x128xf32> -> vector<1x128xf32>
    %c0_35 = arith.constant 0 : index
    %c0_36 = arith.constant 0 : index
    %47 = vector.load %arg15[%c0_35, %c0_36] : memref<1x16xf32, #tpu.memory_space<vmem>>, vector<1x16xf32>
    %cst_37 = arith.constant dense<0.000000e+00> : vector<1x128xf32>
    %48 = tpu.matmul %47, %19, %cst_37 {dimension_numbers = #tpu.dot_dimension_numbers<[1], [0], [0], [1], [0, 0, 1, 1], [], []>} : vector<1x16xf32>, vector<16x128xf32>, vector<1x128xf32> -> vector<1x128xf32>
    %c0_38 = arith.constant 0 : index
    %c0_39 = arith.constant 0 : index
    %49 = vector.load %arg16[%c0_38, %c0_39] : memref<1x16xf32, #tpu.memory_space<vmem>>, vector<1x16xf32>
    %cst_40 = arith.constant dense<0.000000e+00> : vector<1x128xf32>
    %50 = tpu.matmul %49, %19, %cst_40 {dimension_numbers = #tpu.dot_dimension_numbers<[1], [0], [0], [1], [0, 0, 1, 1], [], []>} : vector<1x16xf32>, vector<16x128xf32>, vector<1x128xf32> -> vector<1x128xf32>
    %c0_41 = arith.constant 0 : index
    %c0_42 = arith.constant 0 : index
    %51 = vector.load %arg17[%c0_41, %c0_42] : memref<128x128xf32, #tpu.memory_space<vmem>>, vector<128x128xf32>
    %cst_43 = arith.constant dense<0.000000e+00> : vector<1x128xf32>
    %52 = tpu.matmul %48, %51, %cst_43 {dimension_numbers = #tpu.dot_dimension_numbers<[1], [0], [0], [1], [0, 0, 1, 1], [], []>} : vector<1x128xf32>, vector<128x128xf32>, vector<1x128xf32> -> vector<1x128xf32>
    %53 = tpu.iota {dimensions = array<i32: 1>} : vector<1x128xi32>
    %c4_i32 = arith.constant 4 : i32
    %c0_i32 = arith.constant 0 : i32
    %54 = arith.cmpi eq, %c4_i32, %c0_i32 : i32
    %c1_i32 = arith.constant 1 : i32
    %55 = arith.select %54, %c1_i32, %c4_i32 : i32
    %56 = vector.broadcast %55 : i32 to vector<1x128xi32>
    %57 = arith.remsi %53, %56 : vector<1x128xi32>
    %c0_i32_44 = arith.constant 0 : i32
    %58 = vector.broadcast %c0_i32_44 : i32 to vector<1x128xi32>
    %59 = arith.cmpi ne, %57, %58 : vector<1x128xi32>
    %c0_i32_45 = arith.constant 0 : i32
    %60 = vector.broadcast %c0_i32_45 : i32 to vector<1x128xi32>
    %61 = arith.cmpi slt, %57, %60 : vector<1x128xi32>
    %c0_i32_46 = arith.constant 0 : i32
    %62 = arith.cmpi slt, %55, %c0_i32_46 : i32
    %63 = vector.broadcast %62 : i1 to vector<1x128xi1>
    %64 = vector.broadcast %63 : vector<1x128xi1> to vector<1x128xi1>
    %65 = arith.xori %61, %64 : vector<1x128xi1>
    %66 = arith.andi %65, %59 : vector<1x128xi1>
    %67 = vector.broadcast %55 : i32 to vector<1x128xi32>
    %68 = arith.addi %57, %67 : vector<1x128xi32>
    %69 = arith.select %66, %68, %57 : vector<1x128xi1>, vector<1x128xi32>
    %70 = arith.sitofp %69 : vector<1x128xi32> to vector<1x128xf32>
    %71 = arith.addf %46, %52 : vector<1x128xf32>
    %72 = arith.mulf %70, %50 : vector<1x128xf32>
    %73 = arith.addf %71, %72 : vector<1x128xf32>
    %c0_47 = arith.constant 0 : index
    %c0_48 = arith.constant 0 : index
    %74 = vector.load %arg3[%c0_47, %c0_48] : memref<1x128xf32, #tpu.memory_space<vmem>>, vector<1x128xf32>
    %75 = arith.addf %73, %74 : vector<1x128xf32>
    %cst_49 = arith.constant 1.000000e+00 : f32
    %76 = vector.broadcast %cst_49 : f32 to vector<1x128xf32>
    %77 = arith.mulf %75, %76 : vector<1x128xf32>
    %c0_50 = arith.constant 0 : index
    %c0_51 = arith.constant 0 : index
    %78 = vector.load %arg2[%c0_50, %c0_51] : memref<1x128xf32, #tpu.memory_space<vmem>>, vector<1x128xf32>
    %cst_52 = arith.constant 0.000000e+00 : f32
    %79 = vector.broadcast %cst_52 : f32 to vector<1x128xf32>
    %80 = arith.subf %79, %77 : vector<1x128xf32>
    %cst_53 = arith.constant 0.000000e+00 : f32
    %81 = vector.broadcast %cst_53 : f32 to vector<1x128xf32>
    %82 = arith.maximumf %80, %81 : vector<1x128xf32>
    %83 = math.absf %80 : vector<1x128xf32>
    %cst_54 = arith.constant 0.000000e+00 : f32
    %84 = vector.broadcast %cst_54 : f32 to vector<1x128xf32>
    %85 = arith.subf %84, %83 : vector<1x128xf32>
    %86 = math.exp %85 : vector<1x128xf32>
    %87 = math.log1p %86 : vector<1x128xf32>
    %88 = arith.addf %82, %87 : vector<1x128xf32>
    %89 = arith.mulf %78, %88 : vector<1x128xf32>
    %cst_55 = arith.constant 1.000000e+00 : f32
    %90 = vector.broadcast %cst_55 : f32 to vector<1x128xf32>
    %91 = arith.subf %90, %78 : vector<1x128xf32>
    %cst_56 = arith.constant 0.000000e+00 : f32
    %92 = vector.broadcast %cst_56 : f32 to vector<1x128xf32>
    %93 = arith.maximumf %77, %92 : vector<1x128xf32>
    %94 = math.absf %77 : vector<1x128xf32>
    %cst_57 = arith.constant 0.000000e+00 : f32
    %95 = vector.broadcast %cst_57 : f32 to vector<1x128xf32>
    %96 = arith.subf %95, %94 : vector<1x128xf32>
    %97 = math.exp %96 : vector<1x128xf32>
    %98 = math.log1p %97 : vector<1x128xf32>
    %99 = arith.addf %93, %98 : vector<1x128xf32>
    %100 = arith.mulf %91, %99 : vector<1x128xf32>
    %101 = arith.addf %89, %100 : vector<1x128xf32>
    %cst_58 = arith.constant 0.000000e+00 : f32
    %102 = vector.broadcast %cst_58 : f32 to vector<1x128xf32>
    %103 = arith.subf %102, %101 : vector<1x128xf32>
    %c0_i32_59 = arith.constant 0 : i32
    %104 = vector.broadcast %c0_i32_59 : i32 to vector<1x128xi32>
    %105 = arith.cmpi eq, %69, %104 : vector<1x128xi32>
    %cst_60 = arith.constant 0.000000e+00 : f32
    %106 = vector.broadcast %cst_60 : f32 to vector<1x128xf32>
    %107 = arith.select %105, %106, %103 : vector<1x128xi1>, vector<1x128xf32>
    %c0_61 = arith.constant 0 : index
    %c0_62 = arith.constant 0 : index
    %108 = vector.load %arg18[%c0_61, %c0_62] : memref<1x128xf32, #tpu.memory_space<vmem>>, vector<1x128xf32>
    tpu.vector_store %arg18[%c0_61, %c0_62], %107 {strides = array<i32>} : memref<1x128xf32, #tpu.memory_space<vmem>>, vector<1x128xf32>,
    return
  }
  func.func @transform_0(%arg0: i32) -> (i32, i32) {
    %c0_i32 = arith.constant 0 : i32
    %c0_i32_0 = arith.constant 0 : i32
    return %c0_i32, %arg0 : i32, i32
  }
  func.func @transform_1(%arg0: i32) -> (i32, i32) {
    %c0_i32 = arith.constant 0 : i32
    %c0_i32_0 = arith.constant 0 : i32
    return %c0_i32, %arg0 : i32, i32
  }
  func.func @transform_2(%arg0: i32) -> (i32, i32) {
    %c0_i32 = arith.constant 0 : i32
    %c0_i32_0 = arith.constant 0 : i32
    return %c0_i32, %arg0 : i32, i32
  }
  func.func @transform_3(%arg0: i32) -> (i32, i32) {
    %c0_i32 = arith.constant 0 : i32
    %c0_i32_0 = arith.constant 0 : i32
    %c0_i32_1 = arith.constant 0 : i32
    return %c0_i32, %c0_i32_0 : i32, i32
  }
  func.func @transform_4(%arg0: i32) -> (i32, i32) {
    %c0_i32 = arith.constant 0 : i32
    %c0_i32_0 = arith.constant 0 : i32
    %c0_i32_1 = arith.constant 0 : i32
    return %c0_i32, %c0_i32_0 : i32, i32
  }
  func.func @transform_5(%arg0: i32) -> (i32, i32) {
    %c0_i32 = arith.constant 0 : i32
    %c0_i32_0 = arith.constant 0 : i32
    %c0_i32_1 = arith.constant 0 : i32
    return %c0_i32, %c0_i32_0 : i32, i32
  }
  func.func @transform_6(%arg0: i32) -> (i32, i32) {
    %c0_i32 = arith.constant 0 : i32
    %c0_i32_0 = arith.constant 0 : i32
    %c0_i32_1 = arith.constant 0 : i32
    return %c0_i32, %c0_i32_0 : i32, i32
  }
  func.func @transform_7(%arg0: i32) -> (i32, i32) {
    %c0_i32 = arith.constant 0 : i32
    %c0_i32_0 = arith.constant 0 : i32
    %c0_i32_1 = arith.constant 0 : i32
    return %c0_i32, %c0_i32_0 : i32, i32
  }
  func.func @transform_8(%arg0: i32) -> (i32, i32) {
    %c0_i32 = arith.constant 0 : i32
    %c0_i32_0 = arith.constant 0 : i32
    %c0_i32_1 = arith.constant 0 : i32
    return %c0_i32, %c0_i32_0 : i32, i32
  }
  func.func @transform_9(%arg0: i32) -> (i32, i32) {
    %c0_i32 = arith.constant 0 : i32
    %c0_i32_0 = arith.constant 0 : i32
    %c0_i32_1 = arith.constant 0 : i32
    return %c0_i32, %c0_i32_0 : i32, i32
  }
  func.func @transform_10(%arg0: i32) -> (i32, i32) {
    %c0_i32 = arith.constant 0 : i32
    %c0_i32_0 = arith.constant 0 : i32
    %c0_i32_1 = arith.constant 0 : i32
    return %c0_i32, %c0_i32_0 : i32, i32
  }
  func.func @transform_11(%arg0: i32) -> (i32, i32) {
    %c0_i32 = arith.constant 0 : i32
    %c0_i32_0 = arith.constant 0 : i32
    %c0_i32_1 = arith.constant 0 : i32
    return %c0_i32, %c0_i32_0 : i32, i32
  }
  func.func @transform_12(%arg0: i32) -> (i32, i32) {
    %c0_i32 = arith.constant 0 : i32
    %c0_i32_0 = arith.constant 0 : i32
    %c0_i32_1 = arith.constant 0 : i32
    return %c0_i32, %c0_i32_0 : i32, i32
  }
  func.func @transform_13(%arg0: i32) -> (i32, i32) {
    %c0_i32 = arith.constant 0 : i32
    %c0_i32_0 = arith.constant 0 : i32
    %c0_i32_1 = arith.constant 0 : i32
    return %c0_i32, %c0_i32_0 : i32, i32
  }
  func.func @transform_14(%arg0: i32) -> (i32, i32) {
    %c0_i32 = arith.constant 0 : i32
    %c0_i32_0 = arith.constant 0 : i32
    %c0_i32_1 = arith.constant 0 : i32
    return %c0_i32, %c0_i32_0 : i32, i32
  }
  func.func @transform_15(%arg0: i32) -> (i32, i32) {
    %c0_i32 = arith.constant 0 : i32
    %c0_i32_0 = arith.constant 0 : i32
    %c0_i32_1 = arith.constant 0 : i32
    return %c0_i32, %c0_i32_0 : i32, i32
  }
  func.func @transform_16(%arg0: i32) -> (i32, i32) {
    %c0_i32 = arith.constant 0 : i32
    %c0_i32_0 = arith.constant 0 : i32
    %c0_i32_1 = arith.constant 0 : i32
    return %c0_i32, %c0_i32_0 : i32, i32
  }
  func.func @transform_17(%arg0: i32) -> (i32, i32) {
    %c0_i32 = arith.constant 0 : i32
    %c0_i32_0 = arith.constant 0 : i32
    return %c0_i32, %arg0 : i32, i32
  }
  func.func @transform_18(%arg0: i32) -> (i32, i32) {
    %c0_i32 = arith.constant 0 : i32
    %c0_i32_0 = arith.constant 0 : i32
    return %c0_i32, %arg0 : i32, i32
  }
}

</mosaic_0001>

<bundles_post_ra>
// kernel: state_prediction_forward.1
= control target key start
LH: loop header
LB: loop body
LE: loop exit
PB: predicated region body
PF: predicated region fallthrough
CT: control target
= control target key end

     0   :  { %vm89_vm0 = vcmask 171008   ;;  %v1286_v2 = vmov 0   ;;  %vm102_vm1 = vcmask 1044480   ;;  %vm223_vm2 = vcmask 261120   ;;  %s1600_s0 = inlined_call_operand.vmem [shape: f32[21,128], index: 0, kind: input, shape index: {}]   ;;  %s1601_s3 = inlined_call_operand.vmem [shape: f32[32,21], index: 3, kind: input, shape index: {}]   ;;  %s1602_s4 = inlined_call_operand.vmem [shape: f32[32,1], index: 4, kind: input, shape index: {}]   ;;  %s1603_s6 = inlined_call_operand.vmem [shape: f32[32,1], index: 6, kind: input, shape index: {}]   ;;  %s1604_s8 = inlined_call_operand.vmem [shape: f32[16,1], index: 8, kind: input, shape index: {}]   ;;  %s1605_s10 = inlined_call_operand.vmem [shape: f32[16,1], index: 10, kind: input, shape index: {}]   ;;  %s1606_s12 = inlined_call_operand.vmem [shape: f32[16,1], index: 12, kind: input, shape index: {}]   ;;  %s1607_s5 = inlined_call_operand.vmem [shape: f32[32,32], index: 5, kind: input, shape index: {}]   ;;  %s1608_s7 = inlined_call_operand.vmem [shape: f32[16,32], index: 7, kind: input, shape index: {}]   ;;  %s1609_s9 = inlined_call_operand.vmem [shape: f32[16,16], index: 9, kind: input, shape index: {}]   ;;  %s1610_s16 = inlined_call_operand.vmem [shape: f32[128,128], index: 16, kind: input, shape index: {}]   ;;  %s1611_s14 = inlined_call_operand.vmem [shape: f32[1,16], index: 14, kind: input, shape index: {}]   ;;  %s1612_s11 = inlined_call_operand.vmem [shape: f32[16,16], index: 11, kind: input, shape index: {}]   ;;  %s1613_s15 = inlined_call_operand.vmem [shape: f32[1,16], index: 15, kind: input, shape index: {}]   ;;  %s1614_s13 = inlined_call_operand.vmem [shape: f32[1,16], index: 13, kind: input, shape index: {}]   ;;  %s1615_s18 = inlined_call_operand.vmem [shape: f32[16,128], index: 18, kind: output, shape index: {1}]   ;;  %s1616_s2 = inlined_call_operand.vmem [shape: f32[1,128], index: 2, kind: input, shape index: {}]   ;;  %s1617_s1 = inlined_call_operand.vmem [shape: f32[1,128], index: 1, kind: input, shape index: {}]   ;;  %s1618_s17 = inlined_call_operand.vmem [shape: f32[1,128], index: 17, kind: output, shape index: {0}]  }
   0x1   :  { %1622 = sst [smem:[#allocation2_spill]] %s1600_s0  ;;  %1272 = vset.pattern.permute.xlu0 %v1286_v2  ;;  %1273 = vset.pattern.permute.xlu1 %v1286_v2  ;;  %v199_v12 = vld [vmem:[%s1603_s6] sm:$0xff]  ;;  %v200_v13 = vld [vmem:[%s1603_s6 + $0x8] sm:$0xff]  ;;  %v201_v15 = vld [vmem:[%s1603_s6 + $0x10] sm:$0xff]  ;;  %vm434_vm3 = vcmask 130048   ;;  %vm1288_vm4 = vmmov 0  }
   0x2   :  { %1623 = sst [smem:[#allocation3_spill]] %s1601_s3  ;;  %s1625_s29 = sld [smem:[#allocation2_spill]]  ;;  %v202_v16 = vld [vmem:[%s1603_s6 + $0x18] sm:$0xff]  ;;  %v327_v17 = vld [vmem:[%s1604_s8] sm:$0xff]  ;;  %v328_v18 = vld [vmem:[%s1604_s8 + $0x8] sm:$0xff] }
   0x3   :  { %1624 = sst [smem:[#allocation4_spill]] %s1602_s4  ;;  %s1626_s20 = sld [smem:[#allocation3_spill]]  ;;  %v422_v19 = vld [vmem:[%s1605_s10] sm:$0xff]  ;;  %v423_v20 = vld [vmem:[%s1605_s10 + $0x8] sm:$0xff]  ;;  %v197_v43 = vld [vmem:[%s1607_s5 + $0x10] sm:$0xff] }
   0x4   :  { %s1627_s24 = sld [smem:[#allocation4_spill]]  ;;  %v521_v21 = vld [vmem:[%s1606_s12 + $0x8] sm:$0xff]  ;;  %v520_v22 = vld [vmem:[%s1606_s12] sm:$0xff]  ;;  %v198_v44 = vld [vmem:[%s1607_s5 + $0x18] sm:$0xff] }
   0x5   :  { %v195_v23 = vld [vmem:[%s1607_s5] sm:$0xff]  ;;  %v196_v42 = vld [vmem:[%s1607_s5 + $0x8] sm:$0xff] }
   0x6   :  { %v325_v45 = vld [vmem:[%s1608_s7] sm:$0xff] }
   0x7   :  { %v420_v2 = vld [vmem:[%s1609_s9] sm:$0xff] }
   0x8   :  { %v58_v0 = vld [vmem:[%s1625_s29] sm:$0xff]  ;;  %v59_v1 = vld [vmem:[%s1625_s29 + $0x8] sm:$0xff]  ;;  %v60_v5 = vld [vmem:[%s1625_s29 + $0x10] sm:$0x1f] }
   0x9   :  { %v1207_v3 = vpack.c.bf16 %v59_v1, %v58_v0  ;;  %v61_v4 = vld [vmem:[%s1626_s20] sm:$0xff]  ;;  %v62_v10 = vld [vmem:[%s1626_s20 + $0x8] sm:$0xff]  ;;  %v63_v11 = vld [vmem:[%s1626_s20 + $0x10] sm:$0xff]  ;;  %v1287_v1 = vmov 0.0|0.0  }
   0xa   :  { %1106 = vmatprep.mubr.msk.f32.mxu0 %vm89_vm0, %v61_v4  ;;  %v65_v6 = vld [vmem:[%s1627_s24] sm:$0xff]  ;;  %v67_v7 = vld [vmem:[%s1627_s24 + $0x10] sm:$0xff]  ;;  %v66_v8 = vld [vmem:[%s1627_s24 + $0x8] sm:$0xff]  ;;  %1235 = vmatprep.subr.bf16.mxu1 %v1287_v1 }
   0xb   :  { %1208 = vmatprep.subr.bf16.mxu0 %v1207_v3  ;;  %71 = vperm.xlu0 %1272, %v65_v6   ;;  %v68_v9 = vld [vmem:[%s1627_s24 + $0x18] sm:$0xff]  ;;  %v326_v0 = vld [vmem:[%s1608_s7 + $0x8] sm:$0xff] }
   0xc   :  { %1210 = vmatpush3.bf16.msra.mxu0 %v1207_v3  ;;  %81 = vperm.xlu1 %1273, %v67_v7   ;;  %v64_v14 = vld [vmem:[%s1626_s20 + $0x18] sm:$0xff]  ;;  %v1289_v3 = vmov 0.0  }
   0xd   :  { %1104 = vmatprep.subr.msk.mxu0 %vm102_vm1, %v60_v5  ;;  %1155 = vmatprep.mubr.msk.f32.mxu1 %vm1288_vm4, %v1289_v3 }
   0xf   :  { %76 = vperm.xlu0 %1272, %v66_v8  }
  0x10   :  { %1105 = vmatpush3.msk.msra.mxu0 %vm102_vm1, %v60_v5  ;;  %86 = vperm.xlu1 %1273, %v68_v9  }
  0x11   :  { %1107 = vmatmul.mubr.msk.f32.vlgmr.msra.gmra.mrb[0].mxu0 %vm89_vm0, %v62_v10  ;;  %v801_v10 = vld [vmem:[%s1610_s16] sm:$0xff] }
  0x12   :  { %1109 = vmatprep.mubr.msk.f32.mxu0 %vm89_vm0, %v63_v11  ;;  %v802_v11 = vld [vmem:[%s1610_s16 + $0x8] sm:$0xff] }
  0x13   :  { %205 = vperm.xlu0 %1272, %v199_v12  }
  0x14   :  { %210 = vperm.xlu1 %1273, %v200_v13   ;;  %v653_v13 = vld [vmem:[%s1611_s14] sm:$0x1] }
  0x15   :  { %1110 = vmatmul.mubr.msk.f32.gmra.mrb[2].mxu0 %vm89_vm0, %v64_v14  ;;  %v1242_v14 = vpack.c.bf16 %v802_v11, %v801_v10 }
  0x16   :  { %1120 = vmatprep.mubr.msk.f32.mxu0 %vm223_vm2, %v195_v23  ;;  %v808_v23 = vld [vmem:[%s1610_s16 + $0x38] sm:$0xff] }
  0x17   :  { %215 = vperm.xlu0 %1272, %v201_v15   ;;  %v421_v15 = vld [vmem:[%s1609_s9 + $0x8] sm:$0xff] }
  0x18   :  { %220 = vperm.xlu1 %1273, %v202_v16   ;;  %v803_v16 = vld [vmem:[%s1610_s16 + $0x10] sm:$0xff] }
  0x1b   :  { %331 = vperm.xlu0 %1272, %v327_v17   ;;  %v804_v17 = vld [vmem:[%s1610_s16 + $0x18] sm:$0xff] }
  0x1c   :  { %336 = vperm.xlu1 %1273, %v328_v18   ;;  %v1245_v18 = vpack.c.bf16 %v804_v17, %v803_v16 }
  0x1f   :  { %426 = vperm.xlu0 %1272, %v422_v19   ;;  %v805_v19 = vld [vmem:[%s1610_s16 + $0x20] sm:$0xff] }
  0x20   :  { %431 = vperm.xlu1 %1273, %v423_v20   ;;  %v806_v20 = vld [vmem:[%s1610_s16 + $0x28] sm:$0xff] }
  0x23   :  { %529 = vperm.xlu0 %1272, %v521_v21   ;;  %v1248_v21 = vpack.c.bf16 %v806_v20, %v805_v19 }
  0x24   :  { %524 = vperm.xlu1 %1273, %v520_v22   ;;  %v807_v22 = vld [vmem:[%s1610_s16 + $0x30] sm:$0xff] }
  0x8a   :  { %v72_v24 = vpop.permute.xlu0 %71 }
  0x8b   :  { %v82_v25 = vpop.permute.xlu1 %81 }
  0x8e   :  { %v77_v26 = vpop.permute.xlu0 %76 }
  0x8f   :  { %v87_v32 = vpop.permute.xlu1 %86 }
  0x92   :  { %v206_v47 = vpop.permute.xlu0 %205 }
  0x93   :  { %v211_v46 = vpop.permute.xlu1 %210 }
  0x96   :  { %v216_v56 = vpop.permute.xlu0 %215 }
  0x97   :  { %v221_v53 = vpop.permute.xlu1 %220 }
  0x9a   :  { %v332_v6 = vpop.permute.xlu0 %331 }
  0x9b   :  { %v337_v4 = vpop.permute.xlu1 %336 }
  0xe4   :  { %v1108_v27 = vpop.f32.mrb[0].mxu0 }
  0xe5   :  { %v178_v28 = vadd.f32 %v1108_v27, %v77_v26  ;;  %v172_v29 = vpop.f32.mrb[1].mxu0  ;;  %v810_v26 = vld [vmem:[%s1610_s16 + $0x48] sm:$0xff] }
  0xe6   :  { %v173_v30 = vadd.f32 %v172_v29, %v72_v24  ;;  %v1251_v24 = vpack.c.bf16 %v808_v23, %v807_v22  ;;  %v812_v29 = vld [vmem:[%s1610_s16 + $0x58] sm:$0xff] }
  0xe7   :  { %v192_v31 = vmax.f32 %v178_v28, 0.0  ;;  %v811_v28 = vld [vmem:[%s1610_s16 + $0x50] sm:$0xff] }
  0xe8   :  { %v191_v33 = vmax.f32 %v173_v30, 0.0  ;;  %v1111_v34 = vpop.f32.mrb[2].mxu0  ;;  %v1257_v30 = vpack.c.bf16 %v812_v29, %v811_v28 }
  0xe9   :  { %v188_v35 = vadd.f32 %v1111_v34, %v87_v32  ;;  %v182_v36 = vpop.f32.mrb[3].mxu0  ;;  %v814_v32 = vld [vmem:[%s1610_s16 + $0x68] sm:$0xff] }
  0xea   :  { %v1211_v37 = vpack.c.bf16 %v192_v31, %v191_v33  ;;  %v183_v38 = vadd.f32 %v182_v36, %v82_v25  ;;  %v809_v25 = vld [vmem:[%s1610_s16 + $0x40] sm:$0xff]  ;;  %v816_v36 = vld [vmem:[%s1610_s16 + $0x78] sm:$0xff] }
  0xeb   :  { %v194_v39 = vmax.f32 %v188_v35, 0.0  ;;  %v1254_v27 = vpack.c.bf16 %v810_v26, %v809_v25  ;;  %v813_v31 = vld [vmem:[%s1610_s16 + $0x60] sm:$0xff]  ;;  %v815_v35 = vld [vmem:[%s1610_s16 + $0x70] sm:$0xff] }
  0xec   :  { %v193_v40 = vmax.f32 %v183_v38, 0.0  ;;  %1212 = vmatprep.subr.bf16.mxu0 %v1211_v37  ;;  %v518_v33 = vld [vmem:[%s1612_s11] sm:$0xff]  ;;  %v1260_v34 = vpack.c.bf16 %v814_v32, %v813_v31  ;;  %v432_v38 = vpop.permute.xlu1 %431 }
  0xed   :  { %1214 = vmatpush3.bf16.msra.mxu0 %v1211_v37  ;;  %v1263_v37 = vpack.c.bf16 %v816_v36, %v815_v35 }
  0xee   :  { %v1215_v41 = vpack.c.bf16 %v194_v39, %v193_v40 }
  0xf0   :  { %1216 = vmatprep.subr.bf16.mxu0 %v1215_v41 }
  0xf1   :  { %1218 = vmatpush3.bf16.msra.mxu0 %v1215_v41 }
  0xf4   :  { %1121 = vmatmul.mubr.msk.f32.vlgmr.msra.gmra.mrb[4].mxu0 %vm223_vm2, %v196_v42  ;;  %v427_v42 = vpop.permute.xlu0 %426 }
  0xf5   :  { %1123 = vmatprep.mubr.msk.f32.mxu0 %vm223_vm2, %v197_v43 }
  0xf8   :  { %1124 = vmatmul.mubr.msk.f32.gmra.mrb[6].mxu0 %vm223_vm2, %v198_v44 }
  0xf9   :  { %1134 = vmatprep.mubr.msk.f32.mxu0 %vm223_vm2, %v325_v45 }
 0x1c7   :  { %v1122_v48 = vpop.f32.mrb[4].mxu0 }
 0x1c8   :  { %v308_v49 = vadd.f32 %v1122_v48, %v211_v46  ;;  %v302_v50 = vpop.f32.mrb[5].mxu0 }
 0x1c9   :  { %v303_v51 = vadd.f32 %v302_v50, %v206_v47  ;;  %v727_v50 = vld [vmem:[%s1613_s15] sm:$0x1] }
 0x1ca   :  { %v322_v52 = vmax.f32 %v308_v49, 0.0  ;;  %v519_v49 = vld [vmem:[%s1612_s11 + $0x8] sm:$0xff] }
 0x1cb   :  { %v321_v54 = vmax.f32 %v303_v51, 0.0  ;;  %v1125_v55 = vpop.f32.mrb[6].mxu0  ;;  %v652_v51 = vld [vmem:[%s1614_s13] sm:$0x1] }
 0x1cc   :  { %v318_v57 = vadd.f32 %v1125_v55, %v221_v53  ;;  %v312_v58 = vpop.f32.mrb[7].mxu0 }
 0x1cd   :  { %v1219_v59 = vpack.c.bf16 %v322_v52, %v321_v54  ;;  %v313_v60 = vadd.f32 %v312_v58, %v216_v56  ;;  %v887_v54 = vlaneseq  ;;  %v530_v56 = vpop.permute.xlu0 %529  ;;  %v525_v58 = vpop.permute.xlu1 %524 }
 0x1ce   :  { %v324_v61 = vmax.f32 %v318_v57, 0.0 }
 0x1cf   :  { %v323_v62 = vmax.f32 %v313_v60, 0.0  ;;  %1220 = vmatprep.subr.bf16.mxu0 %v1219_v59  ;;  %v1578_v55 = vand.u32 127, %v887_v54 }
 0x1d0   :  { %1222 = vmatpush3.bf16.msra.mxu0 %v1219_v59 }
 0x1d1   :  { %v1223_v63 = vpack.c.bf16 %v324_v61, %v323_v62  ;;  %v893_v61 = vand.u32 3, %v1578_v55 }
 0x1d3   :  { %1224 = vmatprep.subr.bf16.mxu0 %v1223_v63  ;;  %vm1016_vm8 = vcmp.eq.s32.totalorder %v893_v61, 0 }
 0x1d4   :  { %1226 = vmatpush3.bf16.msra.mxu0 %v1223_v63 }
 0x1d7   :  { %1135 = vmatmul.mubr.msk.f32.vlgmr.msra.gmra.mrb[8].mxu0 %vm223_vm2, %v326_v0 }
 0x1d8   :  { %1141 = vmatprep.mubr.msk.f32.mxu0 %vm434_vm3, %v420_v2  ;;  %v901_v2 = vcvt.s32.f32 %v893_v61 }
 0x2aa   :  { %v1136_v5 = vpop.f32.mrb[8].mxu0 }
 0x2ab   :  { %v417_v7 = vadd.f32 %v1136_v5, %v337_v4  ;;  %v411_v8 = vpop.f32.mrb[9].mxu0 }
 0x2ac   :  { %v412_v9 = vadd.f32 %v411_v8, %v332_v6 }
 0x2ae   :  { %v1489_v12 = vpack.c.bf16 %v417_v7, %v412_v9  ;;  %v977_v9 = vld [vmem:[%s1616_s2] sm:$0x1] }
 0x2b0   :  { %1228 = vmatprep.subr.bf16.mxu0 %v1489_v12  ;;  %1237 = vmatpush3.bf16.msra.mxu1 %v1489_v12 }
 0x2b1   :  { %1230 = vmatpush3.bf16.msra.mxu0 %v1489_v12  ;;  %1241 = vmatprep.subr.bf16.mxu1 %v1287_v1 }
 0x2b3   :  { %1156 = vmatmul.mubr.msk.f32.vlgmr.msra.gmra.mrb[0].mxu1 %vm434_vm3, %v653_v13 }
 0x2b4   :  { %1142 = vmatmul.mubr.msk.f32.vlgmr.msra.gmra.mrb[10].mxu0 %vm434_vm3, %v421_v15  ;;  %1243 = vmatpush3.bf16.msra.mxu1 %v1242_v14 }
 0x2b5   :  { %1244 = vmatprep.subr.bf16.mxu1 %v1287_v1  ;;  %1197 = vmatprep.mubr.msk.f32.mxu1 %vm1288_vm4, %v1289_v3 }
 0x2b6   :  { %1148 = vmatprep.mubr.msk.f32.mxu0 %vm434_vm3, %v518_v33 }
 0x2b8   :  { %1246 = vmatpush3.bf16.msra.mxu1 %v1245_v18 }
 0x2b9   :  { %1247 = vmatprep.subr.bf16.mxu1 %v1287_v1 }
 0x2bc   :  { %1249 = vmatpush3.bf16.msra.mxu1 %v1248_v21 }
 0x2bd   :  { %1250 = vmatprep.subr.bf16.mxu1 %v1287_v1 }
 0x2c0   :  { %1252 = vmatpush3.bf16.msra.mxu1 %v1251_v24 }
 0x2c1   :  { %1253 = vmatprep.subr.bf16.mxu1 %v1287_v1 }
 0x2c4   :  { %1255 = vmatpush3.bf16.msra.mxu1 %v1254_v27 }
 0x2c5   :  { %1256 = vmatprep.subr.bf16.mxu1 %v1287_v1 }
 0x2c8   :  { %1258 = vmatpush3.bf16.msra.mxu1 %v1257_v30 }
 0x2c9   :  { %1259 = vmatprep.subr.bf16.mxu1 %v1287_v1 }
 0x2cc   :  { %1261 = vmatpush3.bf16.msra.mxu1 %v1260_v34 }
 0x2cd   :  { %1262 = vmatprep.subr.bf16.mxu1 %v1287_v1 }
 0x2d0   :  { %1264 = vmatpush3.bf16.msra.mxu1 %v1263_v37 }
 0x386   :  { %v723_v39 = vpop.f32.mrb[0].mxu1 }
 0x387   :  { %v1143_v40 = vpop.f32.mrb[10].mxu0  ;;  %v1157_v41 = vpop.f32.mrb[1].mxu1  ;;  %1198 = vmatmul.mubr.f32.vlgmr.msra.gmra.mrb[2].mxu1 %v723_v39 }
 0x388   :  { %v513_v43 = vadd.f32 %v1143_v40, %v432_v38  ;;  %v507_v44 = vpop.f32.mrb[11].mxu0  ;;  %v979_v41 = vld [vmem:[%s1617_s1] sm:$0x1] }
 0x389   :  { %v508_v45 = vadd.f32 %v507_v44, %v427_v42 }
 0x38a   :  { %v517_v46 = vmax.f32 %v513_v43, 0.0 }
 0x38b   :  { %v516_v47 = vmax.f32 %v508_v45, 0.0 }
 0x38d   :  { %v1231_v48 = vpack.c.bf16 %v517_v46, %v516_v47 }
 0x38f   :  { %1232 = vmatprep.subr.bf16.mxu0 %v1231_v48 }
 0x390   :  { %1234 = vmatpush3.bf16.msra.mxu0 %v1231_v48 }
 0x391   :  { %1238 = vmatprep.subr.bf16.mxu0 %v1287_v1 }
 0x393   :  { %1149 = vmatmul.mubr.msk.f32.vlgmr.msra.gmra.mrb[12].mxu0 %vm434_vm3, %v519_v49 }
 0x394   :  { %1240 = vmatpush3.bf16.msra.mxu0 %v1489_v12  ;;  %1162 = vmatprep.mubr.msk.f32.mxu0 %vm1288_vm4, %v1289_v3 }
 0x395   :  { %1265 = vmatprep.subr.bf16.mxu0 %v1287_v1 }
 0x397   :  { %1163 = vmatmul.mubr.msk.f32.vlgmr.msra.gmra.mrb[14].mxu0 %vm434_vm3, %v727_v50  ;;  %v997_v50 = vsub.f32 1.0, %v979_v41 }
 0x398   :  { %1267 = vmatpush3.bf16.msra.mxu0 %v1489_v12  ;;  %1204 = vmatprep.mubr.msk.f32.mxu0 %vm1288_vm4, %v1289_v3 }
 0x39b   :  { %1205 = vmatmul.mubr.msk.f32.vlgmr.msra.gmra.mrb[16].mxu0 %vm434_vm3, %v652_v51 }
 0x45a   :  { %v883_v52 = vpop.f32.mrb[2].mxu1 }
 0x45b   :  { %v1199_v53 = vpop.f32.mrb[3].mxu1 }
 0x466   :  { %v1150_v57 = vpop.f32.mrb[12].mxu0 }
 0x467   :  { %v610_v59 = vadd.f32 %v1150_v57, %v530_v56  ;;  %v604_v60 = vpop.f32.mrb[13].mxu0 }
 0x468   :  { %v605_v62 = vadd.f32 %v604_v60, %v525_v58 }
 0x469   :  { %v621_v63 = vand.u32 2147483647, %v610_v59  ;;  %v619_v30 = vmax.f32 %v610_v59, 0.0 }
 0x46a   :  { %650 = vst [vmem:[%s1615_s18] sm:$0xff] %v605_v62  ;;  %v797_v0 = vpop.f32.mrb[14].mxu0 }
 0x46b   :  { %v623_v1 = vsub.f32 0.0, %v621_v63  ;;  %v1164_v3 = vpop.f32.mrb[15].mxu0  ;;  %v975_v6 = vmul.f32 %v901_v2, %v797_v0 }
 0x46d   :  { %v626_v4 = vmul.f32 1.442695, %v623_v1 }
 0x46e   :  { %v971_v5 = vpop.f32.mrb[16].mxu0 }
 0x46f   :  { %1274 = vpow2.f32 %v626_v4  ;;  %v972_v7 = vadd.f32 %v971_v5, %v883_v52  ;;  %v1206_v8 = vpop.f32.mrb[17].mxu0 }
 0x471   :  { %v976_v10 = vadd.f32 %v975_v6, %v972_v7 }
 0x473   :  { %v978_v11 = vadd.f32 %v977_v9, %v976_v10 }
 0x475   :  { %v980_v12 = vsub.f32 0.0, %v978_v11  ;;  %v999_v13 = vand.u32 2147483647, %v978_v11  ;;  %v998_v45 = vmax.f32 %v978_v11, 0.0 }
 0x477   :  { %v982_v14 = vand.u32 2147483647, %v980_v12  ;;  %v1000_v15 = vsub.f32 0.0, %v999_v13  ;;  %v981_v49 = vmax.f32 %v980_v12, 0.0 }
 0x479   :  { %v1275_v16 = vpop.eup %1274  ;;  %v983_v17 = vsub.f32 0.0, %v982_v14  ;;  %v1001_v18 = vmul.f32 1.442695, %v1000_v15 }
 0x47a   :  { %v637_v19 = vadd.f32 1.0, %v1275_v16  ;;  %v640_v21 = vmul.f32 -0.5, %v1275_v16  ;;  %v643_v23 = vand.u32 2147483647, %v1275_v16 }
 0x47b   :  { %v984_v20 = vmul.f32 1.442695, %v983_v17  ;;  %1276 = vpow2.f32 %v1001_v18 }
 0x47c   :  { %1278 = vlog2.f32 %v637_v19  ;;  %v641_v22 = vadd.f32 1.0, %v640_v21  ;;  %vm644_vm5 = vcmp.lt.f32.partialorder %v643_v23, 0.0004427343 }
 0x47d   :  { %1280 = vpow2.f32 %v984_v20 }
 0x47e   :  { %v642_v29 = vmul.f32 %v1275_v16, %v641_v22 }
 0x485   :  { %v1277_v24 = vpop.eup %1276 }
 0x486   :  { %v1279_v25 = vpop.eup %1278  ;;  %v1003_v26 = vadd.f32 1.0, %v1277_v24  ;;  %v1006_v34 = vmul.f32 -0.5, %v1277_v24  ;;  %v1009_v37 = vand.u32 2147483647, %v1277_v24 }
 0x487   :  { %v1281_v27 = vpop.eup %1280  ;;  %v639_v28 = vmul.f32 0.6931472, %v1279_v25 }
 0x488   :  { %v986_v31 = vadd.f32 1.0, %v1281_v27  ;;  %1282 = vlog2.f32 %v1003_v26  ;;  %v989_v35 = vmul.f32 -0.5, %v1281_v27  ;;  %v1007_v36 = vadd.f32 1.0, %v1006_v34 }
 0x489   :  { %v645_v32 = vsel %vm644_vm5, %v642_v29, %v639_v28  ;;  %v992_v40 = vand.u32 2147483647, %v1281_v27  ;;  %vm1010_vm6 = vcmp.lt.f32.partialorder %v1009_v37, 0.0004427343 }
 0x48a   :  { %v647_v33 = vadd.f32 %v645_v32, %v619_v30  ;;  %1284 = vlog2.f32 %v986_v31  ;;  %v990_v38 = vadd.f32 1.0, %v989_v35  ;;  %v1008_v43 = vmul.f32 %v1277_v24, %v1007_v36 }
 0x48b   :  { %vm993_vm7 = vcmp.lt.f32.partialorder %v992_v40, 0.0004427343 }
 0x48c   :  { %651 = vst [vmem:[%s1615_s18 + $0x8] sm:$0xff] %v647_v33  ;;  %v991_v47 = vmul.f32 %v1281_v27, %v990_v38 }
 0x492   :  { %v1283_v39 = vpop.eup %1282 }
 0x493   :  { %v1005_v42 = vmul.f32 0.6931472, %v1283_v39 }
 0x494   :  { %v1285_v44 = vpop.eup %1284 }
 0x495   :  { %v988_v46 = vmul.f32 0.6931472, %v1285_v44  ;;  %v1011_v48 = vsel %vm1010_vm6, %v1008_v43, %v1005_v42 }
 0x496   :  { %v1012_v51 = vadd.f32 %v1011_v48, %v998_v45 }
 0x497   :  { %v994_v52 = vsel %vm993_vm7, %v991_v47, %v988_v46 }
 0x498   :  { %v995_v53 = vadd.f32 %v994_v52, %v981_v49  ;;  %v1013_v56 = vmul.f32 %v1012_v51, %v997_v50 }
 0x49a   :  { %v996_v54 = vmul.f32 %v995_v53, %v979_v41 }
 0x49c   :  { %v1014_v57 = vadd.f32 %v1013_v56, %v996_v54 }
 0x49e   :  { %v1015_v58 = vsub.f32 0.0, %v1014_v57 }
 0x4a0   :  { %v1017_v59 = vsel %vm1016_vm8, 0.0, %v1015_v58 }
 0x4a1   :  { %1018 = vst [vmem:[%s1618_s17] sm:$0x1] %v1017_v59 }

</bundles_post_ra>
